<compile_context>
chip_gen: v7x
topology: tpu7x:2x2x1
jax: 0.10.0
libtpu: 0.0.40
codegen_flags: <defaults>
</compile_context>

<pallas_src>
import functools

import jax
import jax.numpy as jnp
from jax.experimental import pallas as pl
from jax.experimental.pallas import tpu as pltpu

LEAK = 0.2
_MiB = 1024 * 1024


def _round_up(n, m):
    return ((n + m - 1) // m) * m


def _leaky_relu(z):
    # mul + max (2 VPU ops) instead of cmp + select (3).
    return jnp.maximum(z, LEAK * z)


def generator_kernel(x_ref, a_ref, y_ref,
                     w1x_ref, w1a_ref, w1y_ref, b1_ref,
                     w2_ref, b2_ref,
                     w3_ref, b3_ref,
                     w4_ref, b4_ref,
                     w5_ref, b5_ref,
                     o_ref):
    """One batch tile through all 5 layers; weights stay resident in VMEM."""
    # Layer 1: [x, a, y] @ W1 + b1 with the a/y columns folded in as rank-1
    # VPU updates (a * W1[row_a] + y * W1[row_y]) -- no concat needed.
    z = jnp.dot(x_ref[...].astype(jnp.bfloat16), w1x_ref[...],
                preferred_element_type=jnp.float32)
    z = z + b1_ref[...] + a_ref[...] * w1a_ref[...] + y_ref[...] * w1y_ref[...]
    h = _leaky_relu(z).astype(jnp.bfloat16)        # bf16 inter-layer storage

    for w_ref, b_ref in ((w2_ref, b2_ref), (w3_ref, b3_ref), (w4_ref, b4_ref)):
        z = jnp.dot(h, w_ref[...], preferred_element_type=jnp.float32) + b_ref[...]
        h = _leaky_relu(z).astype(jnp.bfloat16)

    z = jnp.dot(h, w5_ref[...], preferred_element_type=jnp.float32) + b5_ref[...]
    # Exact sigmoid: exp on the EUP, divide on the VPU - both idle next to the
    # MXU, and it avoids the approx-reciprocal error on the network output.
    o_ref[...] = (1.0 / (1.0 + jnp.exp(-z))).astype(o_ref.dtype)


def init_generator_params(key, input_size, output_size, latent_size):
    """Deterministic synthetic parameters (PyTorch-Linear-like uniform init).
    Weights are stored (in_features, out_features) so the kernel computes
    h @ W + b (same math as PyTorch's x @ W.T + b)."""
    dims = [(input_size + 2, latent_size),
            (latent_size, latent_size),
            (latent_size, latent_size),
            (latent_size, latent_size),
            (latent_size, output_size)]
    params = []
    for (fan_in, fan_out) in dims:
        key, kw, kb = jax.random.split(key, 3)
        bound = 1.0 / jnp.sqrt(jnp.float32(fan_in))
        w = jax.random.uniform(kw, (fan_in, fan_out), jnp.float32, -bound, bound)
        b = jax.random.uniform(kb, (1, fan_out), jnp.float32, -bound, bound)
        params.append((w, b))
    return params


def prepare_generator_params(params, input_size):
    """One-time conversion of PyTorch-layout params into kernel-ready arrays.

    W1 (input_size+2, latent) is split into the x part (rows [0, input_size),
    zero-padded to a multiple of 16 rows for clean bf16 MXU tiling) plus the
    two rank-1 rows for a and y.  Matmul weights go to bf16 (MXU operands);
    biases and the rank-1 rows stay f32 (VPU math)."""
    (w1, b1), (w2, b2), (w3, b3), (w4, b4), (w5, b5) = params
    bf16, f32 = jnp.bfloat16, jnp.float32
    in_pad = _round_up(input_size, 16)
    w1x = jnp.asarray(w1[:input_size], f32)
    w1x = jnp.pad(w1x, ((0, in_pad - input_size), (0, 0))).astype(bf16)
    row = lambda r: jnp.asarray(w1[r:r + 1], f32)
    vec = lambda b: jnp.asarray(b, f32).reshape(1, -1)
    return (w1x, row(input_size), row(input_size + 1), vec(b1),
            jnp.asarray(w2, bf16), vec(b2),
            jnp.asarray(w3, bf16), vec(b3),
            jnp.asarray(w4, bf16), vec(b4),
            jnp.asarray(w5, bf16), vec(b5))


def _pick_tile(batch, max_tile):
    """Largest tile <= max_tile that splits the batch into an even number of
    near-equal grid steps (so both v7x TensorCores get balanced work); a
    single tile only for tiny batches.  Always a multiple of 16 (bf16 tile)."""
    max_tile = max(16, (int(max_tile) // 16) * 16)
    if batch < 32:
        return min(_round_up(batch, 16), max_tile)
    n = 2
    while _round_up(-(-batch // n), 16) > max_tile:
        n += 2
    return _round_up(-(-batch // n), 16)


def _vmem_capacity_bytes():
    try:
        return int(pltpu.get_tpu_info().vmem_capacity_bytes)
    except Exception:
        return 64 * _MiB       # conservative fallback (== v7x per-TC VMEM)


@functools.partial(jax.jit, static_argnames=("tile_b",))
def generator_forward(x, a, y, kparams, tile_b=1024):
    """x: (B, input_size), a/y: (B, 1) -> (B, output_size) float32."""
    B, in_size = x.shape
    w1x = kparams[0]
    in_pad, latent = w1x.shape
    out_size = kparams[-2].shape[1]

    # --- static tile / VMEM planning (shapes only) ---------------------------
    usable = max(32 * _MiB, _vmem_capacity_bytes() - 16 * _MiB)

    def vmem_budget(tb):
        w_bytes = 2 * 2 * (in_pad * latent + 3 * latent * latent
                           + latent * out_size)           # bf16, double-buffered
        io_bytes = 2 * 4 * tb * (in_pad + 2 + out_size)   # f32 x/a/y/out, 2 bufs
        act_bytes = 10 * tb * latent                      # f32 z + ~2 live bf16 h
        return w_bytes + io_bytes + act_bytes + 4 * _MiB  # slack

    tb_cap = max(16, (int(tile_b) // 16) * 16)
    while tb_cap > 256 and vmem_budget(tb_cap) > usable:
        tb_cap //= 2
    tb = _pick_tile(B, tb_cap)
    B_pad = _round_up(B, tb)

    # Pad only what is needed: batch to a tile multiple, x features to the
    # 16-aligned K that the prepared W1x expects (no 128-lane padding).
    if B_pad != B or in_pad != in_size:
        x = jnp.pad(x, ((0, B_pad - B), (0, in_pad - in_size)))
    if B_pad != B:
        a = jnp.pad(a, ((0, B_pad - B), (0, 0)))
        y = jnp.pad(y, ((0, B_pad - B), (0, 0)))

    row_spec = lambda f: pl.BlockSpec((tb, f), lambda i: (i, 0))
    const_spec = lambda arr: pl.BlockSpec(arr.shape, lambda i: (0, 0))
    in_specs = ([row_spec(in_pad), row_spec(1), row_spec(1)]
                + [const_spec(p) for p in kparams])

    out = pl.pallas_call(
        generator_kernel,
        out_shape=jax.ShapeDtypeStruct((B_pad, out_size), jnp.float32),
        grid_spec=pltpu.PrefetchScalarGridSpec(
            num_scalar_prefetch=0,
            grid=(B_pad // tb,),
            in_specs=in_specs,
            out_specs=pl.BlockSpec((tb, out_size), lambda i: (i, 0)),
        ),
        compiler_params=pltpu.CompilerParams(
            dimension_semantics=("parallel",),
            vmem_limit_bytes=int(usable)),
    )(x, a, y, *kparams)
    return out[:B] if B_pad != B else out


def generator_ref(x, a, y, params):
    """Pure-JAX reference replicating the kernel's dtype strategy (bf16 MXU
    operands / f32 accumulation, bf16 inter-layer activations, exact sigmoid)."""
    f32, bf16 = jnp.float32, jnp.bfloat16
    (w1, b1) = params[0]
    in_size = x.shape[1]
    z = jnp.dot(x.astype(bf16), w1[:in_size].astype(bf16),
                preferred_element_type=f32)
    z = z + jnp.asarray(b1, f32).reshape(1, -1) + a * w1[in_size] + y * w1[in_size + 1]
    h = jnp.maximum(z, LEAK * z).astype(bf16)
    for (w, b) in params[1:-1]:
        z = (jnp.dot(h, w.astype(bf16), preferred_element_type=f32)
             + jnp.asarray(b, f32).reshape(1, -1))
        h = jnp.maximum(z, LEAK * z).astype(bf16)
    w, b = params[-1]
    z = (jnp.dot(h, w.astype(bf16), preferred_element_type=f32)
         + jnp.asarray(b, f32).reshape(1, -1))
    return 1.0 / (1.0 + jnp.exp(-z))


if __name__ == "__main__":
    # Small shapes consistent with the module's forward:
    #   x: (B, input_size), a: (B, 1), y: (B, 1)  -> concat dim = input_size + 2
    input_size = 30
    output_size = 64
    latent_size = 256

    key = jax.random.PRNGKey(0)
    kp, kd = jax.random.split(key)
    params = init_generator_params(kp, input_size, output_size, latent_size)
    kparams = prepare_generator_params(params, input_size)

    # Exercise both the single-tile path (B=8) and a 2-step "parallel" grid
    # with batch padding (B=40).
    for B in (8, 40):
        kd, kx, ka, ky = jax.random.split(kd, 4)
        x = jax.random.normal(kx, (B, input_size), jnp.float32)
        a = jax.random.normal(ka, (B, 1), jnp.float32)
        y = jax.random.normal(ky, (B, 1), jnp.float32)

        out = jax.block_until_ready(generator_forward(x, a, y, kparams))
        ref = generator_ref(x, a, y, params)

        assert out.shape == (B, output_size)
        err = float(jnp.max(jnp.abs(out - ref)))
        assert err < 2e-3, f"mismatch vs reference (B={B}): {err}"

    print("KERNEL_OK")
</pallas_src>

<mosaic_0001>
module attributes {stable_mosaic.version = 11 : i64} {
  func.func @generator_kernel(%arg0: i32, %arg1: memref<16x32xf32, #tpu.memory_space<vmem>>, %arg2: memref<16x1xf32, #tpu.memory_space<vmem>>, %arg3: memref<16x1xf32, #tpu.memory_space<vmem>>, %arg4: memref<32x256xbf16, #tpu.memory_space<vmem>>, %arg5: memref<1x256xf32, #tpu.memory_space<vmem>>, %arg6: memref<1x256xf32, #tpu.memory_space<vmem>>, %arg7: memref<1x256xf32, #tpu.memory_space<vmem>>, %arg8: memref<256x256xbf16, #tpu.memory_space<vmem>>, %arg9: memref<1x256xf32, #tpu.memory_space<vmem>>, %arg10: memref<256x256xbf16, #tpu.memory_space<vmem>>, %arg11: memref<1x256xf32, #tpu.memory_space<vmem>>, %arg12: memref<256x256xbf16, #tpu.memory_space<vmem>>, %arg13: memref<1x256xf32, #tpu.memory_space<vmem>>, %arg14: memref<256x64xbf16, #tpu.memory_space<vmem>>, %arg15: memref<1x64xf32, #tpu.memory_space<vmem>>, %arg16: memref<16x64xf32, #tpu.memory_space<vmem>>) attributes {dimension_semantics = [#tpu.dimension_semantics<parallel>], iteration_bounds = array<i64: 1>, scalar_prefetch = 0 : i64, scratch_operands = 0 : i64, tpu.core_type = #tpu.core_type<tc>, window_params = [{transform_indices = @transform_0, window_bounds = array<i64: 16, 32>}, {transform_indices = @transform_1, window_bounds = array<i64: 16, 1>}, {transform_indices = @transform_2, window_bounds = array<i64: 16, 1>}, {pipeline_mode = #tpu.pipeline_mode<synchronous>, transform_indices = @transform_3, window_bounds = array<i64: 32, 256>}, {pipeline_mode = #tpu.pipeline_mode<synchronous>, transform_indices = @transform_4, window_bounds = array<i64: 1, 256>}, {pipeline_mode = #tpu.pipeline_mode<synchronous>, transform_indices = @transform_5, window_bounds = array<i64: 1, 256>}, {pipeline_mode = #tpu.pipeline_mode<synchronous>, transform_indices = @transform_6, window_bounds = array<i64: 1, 256>}, {pipeline_mode = #tpu.pipeline_mode<synchronous>, transform_indices = @transform_7, window_bounds = array<i64: 256, 256>}, {pipeline_mode = #tpu.pipeline_mode<synchronous>, transform_indices = @transform_8, window_bounds = array<i64: 1, 256>}, {pipeline_mode = #tpu.pipeline_mode<synchronous>, transform_indices = @transform_9, window_bounds = array<i64: 256, 256>}, {pipeline_mode = #tpu.pipeline_mode<synchronous>, transform_indices = @transform_10, window_bounds = array<i64: 1, 256>}, {pipeline_mode = #tpu.pipeline_mode<synchronous>, transform_indices = @transform_11, window_bounds = array<i64: 256, 256>}, {pipeline_mode = #tpu.pipeline_mode<synchronous>, transform_indices = @transform_12, window_bounds = array<i64: 1, 256>}, {pipeline_mode = #tpu.pipeline_mode<synchronous>, transform_indices = @transform_13, window_bounds = array<i64: 256, 64>}, {pipeline_mode = #tpu.pipeline_mode<synchronous>, transform_indices = @transform_14, window_bounds = array<i64: 1, 64>}, {transform_indices = @transform_15, window_bounds = array<i64: 16, 64>}]} {
    %c0 = arith.constant 0 : index
    %c0_0 = arith.constant 0 : index
    %0 = vector.load %arg1[%c0, %c0_0] : memref<16x32xf32, #tpu.memory_space<vmem>>, vector<16x32xf32>
    %1 = arith.truncf %0 : vector<16x32xf32> to vector<16x32xbf16>
    %c0_1 = arith.constant 0 : index
    %c0_2 = arith.constant 0 : index
    %2 = vector.load %arg4[%c0_1, %c0_2] : memref<32x256xbf16, #tpu.memory_space<vmem>>, vector<32x256xbf16>
    %cst = arith.constant dense<0.000000e+00> : vector<16x256xf32>
    %3 = tpu.matmul %1, %2, %cst {dimension_numbers = #tpu.dot_dimension_numbers<[1], [0], [0], [1], [0, 0, 1, 1], [], []>} : vector<16x32xbf16>, vector<32x256xbf16>, vector<16x256xf32> -> vector<16x256xf32>
    %c0_3 = arith.constant 0 : index
    %c0_4 = arith.constant 0 : index
    %4 = vector.load %arg7[%c0_3, %c0_4] : memref<1x256xf32, #tpu.memory_space<vmem>>, vector<1x256xf32>
    %5 = vector.broadcast %4 : vector<1x256xf32> to vector<16x256xf32>
    %6 = arith.addf %3, %5 : vector<16x256xf32>
    %c0_5 = arith.constant 0 : index
    %c0_6 = arith.constant 0 : index
    %7 = vector.load %arg2[%c0_5, %c0_6] : memref<16x1xf32, #tpu.memory_space<vmem>>, vector<16x1xf32>
    %c0_7 = arith.constant 0 : index
    %c0_8 = arith.constant 0 : index
    %8 = vector.load %arg5[%c0_7, %c0_8] : memref<1x256xf32, #tpu.memory_space<vmem>>, vector<1x256xf32>
    %9 = vector.broadcast %7 : vector<16x1xf32> to vector<16x256xf32>
    %10 = vector.broadcast %8 : vector<1x256xf32> to vector<16x256xf32>
    %11 = arith.mulf %9, %10 : vector<16x256xf32>
    %12 = arith.addf %6, %11 : vector<16x256xf32>
    %c0_9 = arith.constant 0 : index
    %c0_10 = arith.constant 0 : index
    %13 = vector.load %arg3[%c0_9, %c0_10] : memref<16x1xf32, #tpu.memory_space<vmem>>, vector<16x1xf32>
    %c0_11 = arith.constant 0 : index
    %c0_12 = arith.constant 0 : index
    %14 = vector.load %arg6[%c0_11, %c0_12] : memref<1x256xf32, #tpu.memory_space<vmem>>, vector<1x256xf32>
    %15 = vector.broadcast %13 : vector<16x1xf32> to vector<16x256xf32>
    %16 = vector.broadcast %14 : vector<1x256xf32> to vector<16x256xf32>
    %17 = arith.mulf %15, %16 : vector<16x256xf32>
    %18 = arith.addf %12, %17 : vector<16x256xf32>
    %cst_13 = arith.constant 2.000000e-01 : f32
    %19 = vector.broadcast %cst_13 : f32 to vector<16x256xf32>
    %20 = arith.mulf %19, %18 : vector<16x256xf32>
    %21 = arith.maximumf %18, %20 : vector<16x256xf32>
    %22 = arith.truncf %21 : vector<16x256xf32> to vector<16x256xbf16>
    %c0_14 = arith.constant 0 : index
    %c0_15 = arith.constant 0 : index
    %23 = vector.load %arg8[%c0_14, %c0_15] : memref<256x256xbf16, #tpu.memory_space<vmem>>, vector<256x256xbf16>
    %cst_16 = arith.constant dense<0.000000e+00> : vector<16x256xf32>
    %24 = tpu.matmul %22, %23, %cst_16 {dimension_numbers = #tpu.dot_dimension_numbers<[1], [0], [0], [1], [0, 0, 1, 1], [], []>} : vector<16x256xbf16>, vector<256x256xbf16>, vector<16x256xf32> -> vector<16x256xf32>
    %c0_17 = arith.constant 0 : index
    %c0_18 = arith.constant 0 : index
    %25 = vector.load %arg9[%c0_17, %c0_18] : memref<1x256xf32, #tpu.memory_space<vmem>>, vector<1x256xf32>
    %26 = vector.broadcast %25 : vector<1x256xf32> to vector<16x256xf32>
    %27 = arith.addf %24, %26 : vector<16x256xf32>
    %cst_19 = arith.constant 2.000000e-01 : f32
    %28 = vector.broadcast %cst_19 : f32 to vector<16x256xf32>
    %29 = arith.mulf %28, %27 : vector<16x256xf32>
    %30 = arith.maximumf %27, %29 : vector<16x256xf32>
    %31 = arith.truncf %30 : vector<16x256xf32> to vector<16x256xbf16>
    %c0_20 = arith.constant 0 : index
    %c0_21 = arith.constant 0 : index
    %32 = vector.load %arg10[%c0_20, %c0_21] : memref<256x256xbf16, #tpu.memory_space<vmem>>, vector<256x256xbf16>
    %cst_22 = arith.constant dense<0.000000e+00> : vector<16x256xf32>
    %33 = tpu.matmul %31, %32, %cst_22 {dimension_numbers = #tpu.dot_dimension_numbers<[1], [0], [0], [1], [0, 0, 1, 1], [], []>} : vector<16x256xbf16>, vector<256x256xbf16>, vector<16x256xf32> -> vector<16x256xf32>
    %c0_23 = arith.constant 0 : index
    %c0_24 = arith.constant 0 : index
    %34 = vector.load %arg11[%c0_23, %c0_24] : memref<1x256xf32, #tpu.memory_space<vmem>>, vector<1x256xf32>
    %35 = vector.broadcast %34 : vector<1x256xf32> to vector<16x256xf32>
    %36 = arith.addf %33, %35 : vector<16x256xf32>
    %cst_25 = arith.constant 2.000000e-01 : f32
    %37 = vector.broadcast %cst_25 : f32 to vector<16x256xf32>
    %38 = arith.mulf %37, %36 : vector<16x256xf32>
    %39 = arith.maximumf %36, %38 : vector<16x256xf32>
    %40 = arith.truncf %39 : vector<16x256xf32> to vector<16x256xbf16>
    %c0_26 = arith.constant 0 : index
    %c0_27 = arith.constant 0 : index
    %41 = vector.load %arg12[%c0_26, %c0_27] : memref<256x256xbf16, #tpu.memory_space<vmem>>, vector<256x256xbf16>
    %cst_28 = arith.constant dense<0.000000e+00> : vector<16x256xf32>
    %42 = tpu.matmul %40, %41, %cst_28 {dimension_numbers = #tpu.dot_dimension_numbers<[1], [0], [0], [1], [0, 0, 1, 1], [], []>} : vector<16x256xbf16>, vector<256x256xbf16>, vector<16x256xf32> -> vector<16x256xf32>
    %c0_29 = arith.constant 0 : index
    %c0_30 = arith.constant 0 : index
    %43 = vector.load %arg13[%c0_29, %c0_30] : memref<1x256xf32, #tpu.memory_space<vmem>>, vector<1x256xf32>
    %44 = vector.broadcast %43 : vector<1x256xf32> to vector<16x256xf32>
    %45 = arith.addf %42, %44 : vector<16x256xf32>
    %cst_31 = arith.constant 2.000000e-01 : f32
    %46 = vector.broadcast %cst_31 : f32 to vector<16x256xf32>
    %47 = arith.mulf %46, %45 : vector<16x256xf32>
    %48 = arith.maximumf %45, %47 : vector<16x256xf32>
    %49 = arith.truncf %48 : vector<16x256xf32> to vector<16x256xbf16>
    %c0_32 = arith.constant 0 : index
    %c0_33 = arith.constant 0 : index
    %50 = vector.load %arg14[%c0_32, %c0_33] : memref<256x64xbf16, #tpu.memory_space<vmem>>, vector<256x64xbf16>
    %cst_34 = arith.constant dense<0.000000e+00> : vector<16x64xf32>
    %51 = tpu.matmul %49, %50, %cst_34 {dimension_numbers = #tpu.dot_dimension_numbers<[1], [0], [0], [1], [0, 0, 1, 1], [], []>} : vector<16x256xbf16>, vector<256x64xbf16>, vector<16x64xf32> -> vector<16x64xf32>
    %c0_35 = arith.constant 0 : index
    %c0_36 = arith.constant 0 : index
    %52 = vector.load %arg15[%c0_35, %c0_36] : memref<1x64xf32, #tpu.memory_space<vmem>>, vector<1x64xf32>
    %53 = vector.broadcast %52 : vector<1x64xf32> to vector<16x64xf32>
    %54 = arith.addf %51, %53 : vector<16x64xf32>
    %cst_37 = arith.constant 0.000000e+00 : f32
    %55 = vector.broadcast %cst_37 : f32 to vector<16x64xf32>
    %56 = arith.subf %55, %54 : vector<16x64xf32>
    %57 = math.exp %56 : vector<16x64xf32>
    %cst_38 = arith.constant 1.000000e+00 : f32
    %58 = vector.broadcast %cst_38 : f32 to vector<16x64xf32>
    %59 = arith.addf %58, %57 : vector<16x64xf32>
    %cst_39 = arith.constant 1.000000e+00 : f32
    %60 = vector.broadcast %cst_39 : f32 to vector<16x64xf32>
    %61 = arith.divf %60, %59 : vector<16x64xf32>
    %c0_40 = arith.constant 0 : index
    %c0_41 = arith.constant 0 : index
    %62 = vector.load %arg16[%c0_40, %c0_41] : memref<16x64xf32, #tpu.memory_space<vmem>>, vector<16x64xf32>
    tpu.vector_store %arg16[%c0_40, %c0_41], %61 {strides = array<i32>} : memref<16x64xf32, #tpu.memory_space<vmem>>, vector<16x64xf32>,
    return
  }
  func.func @transform_0(%arg0: i32) -> (i32, i32) {
    %c0_i32 = arith.constant 0 : i32
    %c0_i32_0 = arith.constant 0 : i32
    return %arg0, %c0_i32 : i32, i32
  }
  func.func @transform_1(%arg0: i32) -> (i32, i32) {
    %c0_i32 = arith.constant 0 : i32
    %c0_i32_0 = arith.constant 0 : i32
    return %arg0, %c0_i32 : i32, i32
  }
  func.func @transform_2(%arg0: i32) -> (i32, i32) {
    %c0_i32 = arith.constant 0 : i32
    %c0_i32_0 = arith.constant 0 : i32
    return %arg0, %c0_i32 : i32, i32
  }
  func.func @transform_3(%arg0: i32) -> (i32, i32) {
    %c0_i32 = arith.constant 0 : i32
    %c0_i32_0 = arith.constant 0 : i32
    %c0_i32_1 = arith.constant 0 : i32
    return %c0_i32, %c0_i32_0 : i32, i32
  }
  func.func @transform_4(%arg0: i32) -> (i32, i32) {
    %c0_i32 = arith.constant 0 : i32
    %c0_i32_0 = arith.constant 0 : i32
    %c0_i32_1 = arith.constant 0 : i32
    return %c0_i32, %c0_i32_0 : i32, i32
  }
  func.func @transform_5(%arg0: i32) -> (i32, i32) {
    %c0_i32 = arith.constant 0 : i32
    %c0_i32_0 = arith.constant 0 : i32
    %c0_i32_1 = arith.constant 0 : i32
    return %c0_i32, %c0_i32_0 : i32, i32
  }
  func.func @transform_6(%arg0: i32) -> (i32, i32) {
    %c0_i32 = arith.constant 0 : i32
    %c0_i32_0 = arith.constant 0 : i32
    %c0_i32_1 = arith.constant 0 : i32
    return %c0_i32, %c0_i32_0 : i32, i32
  }
  func.func @transform_7(%arg0: i32) -> (i32, i32) {
    %c0_i32 = arith.constant 0 : i32
    %c0_i32_0 = arith.constant 0 : i32
    %c0_i32_1 = arith.constant 0 : i32
    return %c0_i32, %c0_i32_0 : i32, i32
  }
  func.func @transform_8(%arg0: i32) -> (i32, i32) {
    %c0_i32 = arith.constant 0 : i32
    %c0_i32_0 = arith.constant 0 : i32
    %c0_i32_1 = arith.constant 0 : i32
    return %c0_i32, %c0_i32_0 : i32, i32
  }
  func.func @transform_9(%arg0: i32) -> (i32, i32) {
    %c0_i32 = arith.constant 0 : i32
    %c0_i32_0 = arith.constant 0 : i32
    %c0_i32_1 = arith.constant 0 : i32
    return %c0_i32, %c0_i32_0 : i32, i32
  }
  func.func @transform_10(%arg0: i32) -> (i32, i32) {
    %c0_i32 = arith.constant 0 : i32
    %c0_i32_0 = arith.constant 0 : i32
    %c0_i32_1 = arith.constant 0 : i32
    return %c0_i32, %c0_i32_0 : i32, i32
  }
  func.func @transform_11(%arg0: i32) -> (i32, i32) {
    %c0_i32 = arith.constant 0 : i32
    %c0_i32_0 = arith.constant 0 : i32
    %c0_i32_1 = arith.constant 0 : i32
    return %c0_i32, %c0_i32_0 : i32, i32
  }
  func.func @transform_12(%arg0: i32) -> (i32, i32) {
    %c0_i32 = arith.constant 0 : i32
    %c0_i32_0 = arith.constant 0 : i32
    %c0_i32_1 = arith.constant 0 : i32
    return %c0_i32, %c0_i32_0 : i32, i32
  }
  func.func @transform_13(%arg0: i32) -> (i32, i32) {
    %c0_i32 = arith.constant 0 : i32
    %c0_i32_0 = arith.constant 0 : i32
    %c0_i32_1 = arith.constant 0 : i32
    return %c0_i32, %c0_i32_0 : i32, i32
  }
  func.func @transform_14(%arg0: i32) -> (i32, i32) {
    %c0_i32 = arith.constant 0 : i32
    %c0_i32_0 = arith.constant 0 : i32
    %c0_i32_1 = arith.constant 0 : i32
    return %c0_i32, %c0_i32_0 : i32, i32
  }
  func.func @transform_15(%arg0: i32) -> (i32, i32) {
    %c0_i32 = arith.constant 0 : i32
    %c0_i32_0 = arith.constant 0 : i32
    return %arg0, %c0_i32 : i32, i32
  }
}

</mosaic_0001>

<bundles_post_ra>
// kernel: generator_forward.1
= control target key start
LH: loop header
LB: loop body
LE: loop exit
PB: predicated region body
PF: predicated region fallthrough
CT: control target
= control target key end

     0   :  { %20 = vsyncpa [#allocation3], 0  ;;  %s2146_s0 = inlined_call_operand.vmem [shape: f32[16,32], index: 0, kind: input, shape index: {}]   ;;  %s2147_s1 = inlined_call_operand.vmem [shape: f32[16,1], index: 1, kind: input, shape index: {}]   ;;  %s2148_s2 = inlined_call_operand.vmem [shape: f32[16,1], index: 2, kind: input, shape index: {}]   ;;  %s2149_s3 = inlined_call_operand.hbm [shape: bf16[32,256], index: 3, kind: input, shape index: {}]   ;;  %s2150_s4 = inlined_call_operand.vmem [shape: f32[1,256], index: 4, kind: input, shape index: {}]   ;;  %s2151_s5 = inlined_call_operand.hbm [shape: f32[1,256], index: 5, kind: input, shape index: {}]   ;;  %s2152_s6 = inlined_call_operand.hbm [shape: f32[1,256], index: 6, kind: input, shape index: {}]   ;;  %s2153_s7 = inlined_call_operand.vmem [shape: bf16[256,256], index: 7, kind: input, shape index: {}]   ;;  %s2154_s8 = inlined_call_operand.hbm [shape: f32[1,256], index: 8, kind: input, shape index: {}]   ;;  %s2155_s9 = inlined_call_operand.hbm [shape: bf16[256,256], index: 9, kind: input, shape index: {}]   ;;  %s2156_s10 = inlined_call_operand.hbm [shape: f32[1,256], index: 10, kind: input, shape index: {}]   ;;  %s2157_s11 = inlined_call_operand.hbm [shape: bf16[256,256], index: 11, kind: input, shape index: {}]   ;;  %s2158_s12 = inlined_call_operand.vmem [shape: f32[1,256], index: 12, kind: input, shape index: {}]   ;;  %s2159_s13 = inlined_call_operand.vmem [shape: bf16[256,64], index: 13, kind: input, shape index: {}]   ;;  %s2160_s14 = inlined_call_operand.vmem [shape: f32[1,64], index: 14, kind: input, shape index: {}]   ;;  %s2161_s15 = inlined_call_operand.vmem [shape: f32[16,64], index: 15, kind: output, shape index: {}]  }
   0x1   :  { %21 = vsyncpa [#allocation5], 0 }
   0x2   :  { %22 = vsyncpa [#allocation8], 0 }
   0x3   :  { %23 = vsyncpa [#allocation11], 0  ;;  %s1756_s18 = smov [#allocation4]   ;;  %s1757_s20 = smov [#allocation7]  }
   0x4   :  { %s50_s19 = sshll.u32 %s1756_s18, 4  ;;  %s72_s21 = sshll.u32 %s1757_s20, 4  ;;  %s51_s19 = int_to_ptr.vmem [resolvable:$true] %s50_s19  ;;  %s73_s21 = int_to_ptr.vmem [resolvable:$true] %s72_s21 }
   0x5   :  { %s1594_s24 = scalar_lea.hbm %s2151_s5, 32 }
   0x6   :  { %p1595_p0 = scmp.ne.s32.totalorder %s2151_s5, %s1594_s24  ;;  %p1598_p1 = scmp.lt.u32.totalorder %s1594_s24, %s2151_s5 }
   0x8   :  { %p1600_p2 = pnand %p1598_p1, %p1595_p0 }
   0xa   :  { %1603 = shalt.err (!%p1600_p2)
}
   0xb   :  { %s1604_s29 = scalar_lea.vmem %s51_s19, 32  ;;  %p1609_p4 = scmp.lt.s32.totalorder %s51_s19, %s51_s19 }
   0xc   :  { %p1605_p3 = scmp.ne.s32.totalorder %s51_s19, %s1604_s29  ;;  %p1610_p5 = scmp.lt.s32.totalorder %s1604_s29, %s1604_s29 }
   0xe   :  { %p1611_p6 = por %p1610_p5, %p1609_p4 }
  0x10   :  { %p1612_p7 = pnand %p1611_p6, %p1605_p3 }
  0x12   :  { %1615 = shalt.err (!%p1612_p7)
}
  0x13   :  { %53 = dma.hbm_to_vmem [thread:$0]  %s2151_s5, 32, %s51_s19, [#allocation5]  }
  0x14   :  { %s1616_s20 = scalar_lea.hbm %s2154_s8, 32 }
  0x15   :  { %p1617_p8 = scmp.ne.s32.totalorder %s2154_s8, %s1616_s20  ;;  %p1620_p9 = scmp.lt.u32.totalorder %s1616_s20, %s2154_s8 }
  0x17   :  { %p1622_p10 = pnand %p1620_p9, %p1617_p8 }
  0x19   :  { %1625 = shalt.err (!%p1622_p10)
}
  0x1a   :  { %s1626_s26 = scalar_lea.vmem %s73_s21, 32  ;;  %p1631_p12 = scmp.lt.s32.totalorder %s73_s21, %s73_s21 }
  0x1b   :  { %p1627_p11 = scmp.ne.s32.totalorder %s73_s21, %s1626_s26  ;;  %p1632_p13 = scmp.lt.s32.totalorder %s1626_s26, %s1626_s26 }
  0x1d   :  { %p1633_p0 = por %p1632_p13, %p1631_p12 }
  0x1f   :  { %p1634_p1 = pnand %p1633_p0, %p1627_p11 }
  0x21   :  { %1637 = shalt.err (!%p1634_p1)
}
  0x22   :  { %75 = dma.hbm_to_vmem [thread:$0]  %s2154_s8, 32, %s73_s21, [#allocation8]  }
  0x23   :  { %s1758_s27 = smov [#allocation10]   ;;  %s1759_s29 = smov [#allocation2]  }
  0x24   :  { %s94_s28 = sshll.u32 %s1758_s27, 4  ;;  %s35_s30 = sshll.u32 %s1759_s29, 4  ;;  %s95_s28 = int_to_ptr.vmem [resolvable:$true] %s94_s28  ;;  %s1870_s30 = int_to_ptr.vmem [resolvable:$true] %s35_s30 }
  0x25   :  { %s1638_s18 = scalar_lea.hbm %s2156_s10, 32 }
  0x26   :  { %p1639_p2 = scmp.ne.s32.totalorder %s2156_s10, %s1638_s18  ;;  %p1642_p3 = scmp.lt.u32.totalorder %s1638_s18, %s2156_s10 }
  0x28   :  { %p1644_p4 = pnand %p1642_p3, %p1639_p2 }
  0x2a   :  { %1647 = shalt.err (!%p1644_p4)
}
  0x2b   :  { %s1648_s8 = scalar_lea.vmem %s95_s28, 32  ;;  %p1653_p6 = scmp.lt.s32.totalorder %s95_s28, %s95_s28 }
  0x2c   :  { %p1649_p5 = scmp.ne.s32.totalorder %s95_s28, %s1648_s8  ;;  %p1654_p7 = scmp.lt.s32.totalorder %s1648_s8, %s1648_s8 }
  0x2e   :  { %p1655_p8 = por %p1654_p7, %p1653_p6 }
  0x30   :  { %p1656_p9 = pnand %p1655_p8, %p1649_p5 }
  0x32   :  { %1659 = shalt.err (!%p1656_p9)
}
  0x33   :  { %97 = dma.hbm_to_vmem [thread:$0]  %s2156_s10, 32, %s95_s28, [#allocation11]  }
  0x34   :  { %s1660_s19 = scalar_lea.hbm %s2149_s3, 512 }
  0x35   :  { %p1661_p10 = scmp.ne.s32.totalorder %s2149_s3, %s1660_s19  ;;  %p1664_p11 = scmp.lt.u32.totalorder %s1660_s19, %s2149_s3 }
  0x37   :  { %p1666_p12 = pnand %p1664_p11, %p1661_p10 }
  0x39   :  { %1669 = shalt.err (!%p1666_p12)
}
  0x3a   :  { %s1670_s18 = scalar_lea.vmem %s1870_s30, 512  ;;  %p1675_p0 = scmp.lt.s32.totalorder %s1870_s30, %s1870_s30 }
  0x3b   :  { %p1671_p13 = scmp.ne.s32.totalorder %s1870_s30, %s1670_s18  ;;  %p1676_p1 = scmp.lt.s32.totalorder %s1670_s18, %s1670_s18 }
  0x3d   :  { %p1677_p2 = por %p1676_p1, %p1675_p0 }
  0x3f   :  { %p1678_p3 = pnand %p1677_p2, %p1671_p13 }
  0x41   :  { %1681 = shalt.err (!%p1678_p3)
}
  0x42   :  { %s1760_s10 = smov 128   ;;  %s1761_s28 = smov 8  }
  0x43   :  { %41 = dma.hbm_to_vmem [thread:$0]  %s2149_s3, 512, %s1870_s30, [#allocation3], %s1760_s10, %s1760_s10, %s1761_s28  }
  0x44   :  { %s1762_s23 = smov [#allocation6]   ;;  %s1763_s8 = smov [#allocation9]  }
  0x45   :  { %s60_s24 = sshll.u32 %s1762_s23, 4  ;;  %s81_s21 = sshll.u32 %s1763_s8, 4  ;;  %s61_s24 = int_to_ptr.vmem [resolvable:$true] %s60_s24  ;;  %s1904_s21 = int_to_ptr.vmem [resolvable:$true] %s81_s21 }
  0x46   :  { %s1682_s5 = scalar_lea.hbm %s2152_s6, 32 }
  0x47   :  { %p1683_p4 = scmp.ne.s32.totalorder %s2152_s6, %s1682_s5  ;;  %p1686_p5 = scmp.lt.u32.totalorder %s1682_s5, %s2152_s6 }
  0x49   :  { %p1688_p6 = pnand %p1686_p5, %p1683_p4 }
  0x4b   :  { %1691 = shalt.err (!%p1688_p6)
}
  0x4c   :  { %s1692_s3 = scalar_lea.vmem %s61_s24, 32  ;;  %p1697_p8 = scmp.lt.s32.totalorder %s61_s24, %s61_s24 }
  0x4d   :  { %p1693_p7 = scmp.ne.s32.totalorder %s61_s24, %s1692_s3  ;;  %p1698_p9 = scmp.lt.s32.totalorder %s1692_s3, %s1692_s3 }
  0x4f   :  { %p1699_p10 = por %p1698_p9, %p1697_p8 }
  0x51   :  { %p1700_p11 = pnand %p1699_p10, %p1693_p7 }
  0x53   :  { %1703 = shalt.err (!%p1700_p11)
}
  0x54   :  { %63 = dma.hbm_to_vmem [thread:$0]  %s2152_s6, 32, %s61_s24, [#allocation5]  }
  0x55   :  { %s1704_s22 = scalar_lea.hbm %s2155_s9, 4096 }
  0x56   :  { %p1705_p12 = scmp.ne.s32.totalorder %s2155_s9, %s1704_s22  ;;  %p1708_p13 = scmp.lt.u32.totalorder %s1704_s22, %s2155_s9 }
  0x58   :  { %p1710_p0 = pnand %p1708_p13, %p1705_p12 }
  0x5a   :  { %1713 = shalt.err (!%p1710_p0)
}
  0x5b   :  { %s1714_s5 = scalar_lea.vmem %s1904_s21, 4096  ;;  %p1719_p2 = scmp.lt.s32.totalorder %s1904_s21, %s1904_s21 }
  0x5c   :  { %p1715_p1 = scmp.ne.s32.totalorder %s1904_s21, %s1714_s5  ;;  %p1720_p3 = scmp.lt.s32.totalorder %s1714_s5, %s1714_s5 }
  0x5e   :  { %p1721_p4 = por %p1720_p3, %p1719_p2 }
  0x60   :  { %p1722_p5 = pnand %p1721_p4, %p1715_p1 }
  0x62   :  { %1725 = shalt.err (!%p1722_p5)
}
  0x63   :  { %87 = dma.hbm_to_vmem [thread:$0]  %s2155_s9, 4096, %s1904_s21, [#allocation8], %s1760_s10, %s1760_s10, %s1761_s28  }
  0x64   :  { %s1764_s19 = smov [#allocation12]   ;;  %s1726_s3 = scalar_lea.hbm %s2157_s11, 4096 }
  0x65   :  { %s103_s27 = sshll.u32 %s1764_s19, 4  ;;  %p1727_p6 = scmp.ne.s32.totalorder %s2157_s11, %s1726_s3  ;;  %s104_s27 = int_to_ptr.vmem [resolvable:$true] %s103_s27 }
  0x66   :  { %p1730_p7 = scmp.lt.u32.totalorder %s1726_s3, %s2157_s11 }
  0x68   :  { %p1732_p8 = pnand %p1730_p7, %p1727_p6 }
  0x6a   :  { %1735 = shalt.err (!%p1732_p8)
}
  0x6b   :  { %s1736_s22 = scalar_lea.vmem %s104_s27, 4096  ;;  %p1741_p10 = scmp.lt.s32.totalorder %s104_s27, %s104_s27 }
  0x6c   :  { %p1737_p9 = scmp.ne.s32.totalorder %s104_s27, %s1736_s22  ;;  %p1742_p11 = scmp.lt.s32.totalorder %s1736_s22, %s1736_s22 }
  0x6e   :  { %p1743_p12 = por %p1742_p11, %p1741_p10 }
  0x70   :  { %p1744_p13 = pnand %p1743_p12, %p1737_p9 }
  0x72   :  { %1747 = shalt.err (!%p1744_p13)
}
  0x73   :  { %109 = dma.hbm_to_vmem [thread:$0]  %s2157_s11, 4096, %s104_s27, [#allocation11], %s1760_s10, %s1760_s10, %s1761_s28  }
  0x74   :  { %1748 = dma.done.wait [#allocation3], 512  }
  0x75   :  { %1749 = vsyncadd [#allocation3], 4294966784 }
  0x76   :  { %1750 = dma.done.wait [#allocation5], 64  }
  0x77   :  { %1751 = vsyncadd [#allocation5], 4294967232 }
  0x78   :  { %1752 = dma.done.wait [#allocation8], 4128  }
  0x79   :  { %1753 = vsyncadd [#allocation8], 4294963168 }
  0x7a   :  { %1754 = dma.done.wait [#allocation11], 4128  }
  0x7b   :  { %1755 = vsyncadd [#allocation11], 4294963168  ;;  %v1765_v0 = vmov 0   ;;  %v1420_v1 = vld [vmem:[#allocation2 + $0x4] ss:$8 sps:$4 sm:$0xff]   ;;  %vm177_vm0 = vcmask 261120  }
  0x7c   :  { %213 = vmatprep.mubr.bf16.mxu0 %v1765_v0  ;;  %1418 = vset.pattern.permute.xlu0 %v1765_v0  ;;  %v1422_v2 = vld [vmem:[#allocation2] ss:$8 sps:$4 sm:$0xff]   ;;  %v1423_v3 = vld [vmem:[#allocation2 + $0x14] ss:$8 sps:$4 sm:$0xff]   ;;  %v1425_v4 = vld [vmem:[#allocation2 + $0x10] ss:$8 sps:$4 sm:$0xff]  }
  0x7d   :  { %1419 = vset.pattern.permute.xlu1 %v1765_v0  ;;  %181 = vmatprep.subr.bf16.mxu0 %v1420_v1  ;;  %v138_v5 = vld [vmem:[%s2146_s0] sm:$0xff]  ;;  %v139_v6 = vld [vmem:[%s2146_s0 + $0x8] sm:$0xff]  ;;  %v1429_v14 = vld [vmem:[%s2153_s7 + $0x14] ss:$8 sps:$4 sm:$0xff]   ;;  %vm1257_vm1 = vcmask 523264  }
  0x7e   :  { %182 = vmatpush1.bf16.msra.mxu0 %v1422_v2  ;;  %v224_v7 = vld [vmem:[%s2147_s1] sm:$0xff]  ;;  %v225_v9 = vld [vmem:[%s2147_s1 + $0x8] sm:$0xff]  ;;  %v140_v13 = vpack.c.bf16 %v139_v6, %v138_v5  ;;  %v1431_v15 = vld [vmem:[%s2153_s7 + $0x10] ss:$8 sps:$4 sm:$0xff]   ;;  %v147_v6 = vlaneseq }
  0x7f   :  { %v256_v8 = vld [vmem:[%s2148_s2] sm:$0xff]  ;;  %183 = vmatprep.subr.bf16.mxu0 %v1423_v3  ;;  %229 = vperm.xlu0 %1418, %v224_v7   ;;  %v257_v10 = vld [vmem:[%s2148_s2 + $0x8] sm:$0xff]  ;;  %v1435_v18 = vld [vmem:[%s2153_s7 + $0x34] ss:$8 sps:$4 sm:$0xff]  }
  0x80   :  { %261 = vperm.xlu1 %1419, %v256_v8   ;;  %v1426_v11 = vld [vmem:[%s2153_s7 + $0x4] ss:$8 sps:$4 sm:$0xff]   ;;  %v1428_v12 = vld [vmem:[%s2153_s7] ss:$8 sps:$4 sm:$0xff]   ;;  %v1437_v19 = vld [vmem:[%s2153_s7 + $0x30] ss:$8 sps:$4 sm:$0xff]  }
  0x81   :  { %502 = vmatprep.subr.bf16.mxu1 %v1426_v11  ;;  %v1432_v16 = vld [vmem:[%s2153_s7 + $0x24] ss:$8 sps:$4 sm:$0xff]   ;;  %v1434_v17 = vld [vmem:[%s2153_s7 + $0x20] ss:$8 sps:$4 sm:$0xff]   ;;  %v1441_v22 = vld [vmem:[%s2153_s7 + $0x54] ss:$8 sps:$4 sm:$0xff]  }
  0x82   :  { %184 = vmatpush1.bf16.msra.mxu0 %v1425_v4  ;;  %503 = vmatpush1.bf16.msra.mxu1 %v1428_v12  ;;  %v1438_v20 = vld [vmem:[%s2153_s7 + $0x44] ss:$8 sps:$4 sm:$0xff]   ;;  %v1440_v21 = vld [vmem:[%s2153_s7 + $0x40] ss:$8 sps:$4 sm:$0xff]   ;;  %v1443_v23 = vld [vmem:[%s2153_s7 + $0x50] ss:$8 sps:$4 sm:$0xff]  }
  0x83   :  { %234 = vperm.xlu0 %1418, %v225_v9   ;;  %504 = vmatprep.subr.bf16.mxu1 %v1429_v14  ;;  %v1444_v24 = vld [vmem:[%s2153_s7 + $0x64] ss:$8 sps:$4 sm:$0xff]   ;;  %v1446_v25 = vld [vmem:[%s2153_s7 + $0x60] ss:$8 sps:$4 sm:$0xff]   ;;  %v1447_v26 = vld [vmem:[%s2153_s7 + $0x74] ss:$8 sps:$4 sm:$0xff]  }
  0x84   :  { %266 = vperm.xlu1 %1419, %v257_v10   ;;  %v1449_v27 = vld [vmem:[%s2153_s7 + $0x70] ss:$8 sps:$4 sm:$0xff]   ;;  %v1450_v28 = vld [vmem:[%s2153_s7 + $0x84] ss:$8 sps:$4 sm:$0xff]   ;;  %v1452_v29 = vld [vmem:[%s2153_s7 + $0x80] ss:$8 sps:$4 sm:$0xff]  }
  0x85   :  { %1272 = vmatmul.mubr.msk.bf16.vlgmr.msra.gmra.mrb[0].mxu0 %vm177_vm0, %v140_v13  ;;  %v1453_v30 = vld [vmem:[%s2153_s7 + $0x94] ss:$8 sps:$4 sm:$0xff]   ;;  %v1455_v31 = vld [vmem:[%s2153_s7 + $0x90] ss:$8 sps:$4 sm:$0xff]   ;;  %v1456_v32 = vld [vmem:[%s2153_s7 + $0xa4] ss:$8 sps:$4 sm:$0xff]  }
  0x86   :  { %505 = vmatpush1.bf16.msra.mxu1 %v1431_v15  ;;  %v1458_v33 = vld [vmem:[%s2153_s7 + $0xa0] ss:$8 sps:$4 sm:$0xff]   ;;  %v1459_v34 = vld [vmem:[%s2153_s7 + $0xb4] ss:$8 sps:$4 sm:$0xff]   ;;  %v1461_v35 = vld [vmem:[%s2153_s7 + $0xb0] ss:$8 sps:$4 sm:$0xff]  }
  0x87   :  { %506 = vmatprep.subr.bf16.mxu1 %v1432_v16  ;;  %v1462_v36 = vld [vmem:[%s2153_s7 + $0xc4] ss:$8 sps:$4 sm:$0xff]   ;;  %v1464_v37 = vld [vmem:[%s2153_s7 + $0xc0] ss:$8 sps:$4 sm:$0xff]   ;;  %v1465_v38 = vld [vmem:[%s2153_s7 + $0xd4] ss:$8 sps:$4 sm:$0xff]  }
  0x88   :  { %v1467_v39 = vld [vmem:[%s2153_s7 + $0xd0] ss:$8 sps:$4 sm:$0xff]   ;;  %v1468_v40 = vld [vmem:[%s2153_s7 + $0xe4] ss:$8 sps:$4 sm:$0xff]   ;;  %v1470_v41 = vld [vmem:[%s2153_s7 + $0xe0] ss:$8 sps:$4 sm:$0xff]  }
  0x89   :  { %v1471_v42 = vld [vmem:[%s2153_s7 + $0xf4] ss:$8 sps:$4 sm:$0xff]   ;;  %v1473_v43 = vld [vmem:[%s2153_s7 + $0xf0] ss:$8 sps:$4 sm:$0xff]   ;;  %v148_v7 = vshrl.u32 %v147_v6, 7 }
  0x8a   :  { %507 = vmatpush1.bf16.msra.mxu1 %v1434_v17  ;;  %v1474_v44 = vld [vmem:[#allocation9] ss:$8 sps:$4 sm:$0xff]   ;;  %v1476_v45 = vld [vmem:[#allocation9 + $0x4] ss:$8 sps:$4 sm:$0xff]   ;;  %v1479_v46 = vld [vmem:[#allocation9 + $0x14] ss:$8 sps:$4 sm:$0xff]  }
  0x8b   :  { %508 = vmatprep.subr.bf16.mxu1 %v1435_v18  ;;  %759 = vmatprep.subr.bf16.mxu0 %v1476_v45  ;;  %v1477_v47 = vld [vmem:[#allocation9 + $0x10] ss:$8 sps:$4 sm:$0xff]   ;;  %v1482_v48 = vld [vmem:[#allocation9 + $0x24] ss:$8 sps:$4 sm:$0xff]   ;;  %v1480_v49 = vld [vmem:[#allocation9 + $0x20] ss:$8 sps:$4 sm:$0xff]  }
  0x8c   :  { %760 = vmatpush1.bf16.msra.mxu0 %v1474_v44  ;;  %v1485_v50 = vld [vmem:[#allocation9 + $0x34] ss:$8 sps:$4 sm:$0xff]   ;;  %v1483_v51 = vld [vmem:[#allocation9 + $0x30] ss:$8 sps:$4 sm:$0xff]   ;;  %v1488_v52 = vld [vmem:[#allocation9 + $0x44] ss:$8 sps:$4 sm:$0xff]  }
  0x8d   :  { %761 = vmatprep.subr.bf16.mxu0 %v1479_v46  ;;  %v1486_v53 = vld [vmem:[#allocation9 + $0x40] ss:$8 sps:$4 sm:$0xff]   ;;  %v1491_v54 = vld [vmem:[#allocation9 + $0x54] ss:$8 sps:$4 sm:$0xff]   ;;  %v1489_v55 = vld [vmem:[#allocation9 + $0x50] ss:$8 sps:$4 sm:$0xff]  }
  0x8e   :  { %509 = vmatpush1.bf16.msra.mxu1 %v1437_v19  ;;  %v1494_v56 = vld [vmem:[#allocation9 + $0x64] ss:$8 sps:$4 sm:$0xff]   ;;  %v1492_v57 = vld [vmem:[#allocation9 + $0x60] ss:$8 sps:$4 sm:$0xff]   ;;  %v1497_v58 = vld [vmem:[#allocation9 + $0x74] ss:$8 sps:$4 sm:$0xff]  }
  0x8f   :  { %510 = vmatprep.subr.bf16.mxu1 %v1438_v20  ;;  %v1495_v59 = vld [vmem:[#allocation9 + $0x70] ss:$8 sps:$4 sm:$0xff]   ;;  %v1500_v60 = vld [vmem:[#allocation9 + $0x84] ss:$8 sps:$4 sm:$0xff]   ;;  %v1498_v61 = vld [vmem:[#allocation9 + $0x80] ss:$8 sps:$4 sm:$0xff]  }
  0x90   :  { %762 = vmatpush1.bf16.msra.mxu0 %v1477_v47  ;;  %v1503_v62 = vld [vmem:[#allocation9 + $0x94] ss:$8 sps:$4 sm:$0xff]   ;;  %v1501_v63 = vld [vmem:[#allocation9 + $0x90] ss:$8 sps:$4 sm:$0xff]   ;;  %v1506_v0 = vld [vmem:[#allocation9 + $0xa4] ss:$8 sps:$4 sm:$0xff]  }
  0x91   :  { %763 = vmatprep.subr.bf16.mxu0 %v1482_v48  ;;  %v1504_v1 = vld [vmem:[#allocation9 + $0xa0] ss:$8 sps:$4 sm:$0xff]   ;;  %v1509_v2 = vld [vmem:[#allocation9 + $0xb4] ss:$8 sps:$4 sm:$0xff]   ;;  %v1507_v3 = vld [vmem:[#allocation9 + $0xb0] ss:$8 sps:$4 sm:$0xff]  }
  0x92   :  { %511 = vmatpush1.bf16.msra.mxu1 %v1440_v21  ;;  %v1512_v4 = vld [vmem:[#allocation9 + $0xc4] ss:$8 sps:$4 sm:$0xff]   ;;  %v1510_v5 = vld [vmem:[#allocation9 + $0xc0] ss:$8 sps:$4 sm:$0xff]   ;;  %v2067_v8 = vsub.s32 0, %v148_v7  ;;  %v2072_v10 = vsub.s32 1, %v148_v7 }
  0x93   :  { %512 = vmatprep.subr.bf16.mxu1 %v1441_v22  ;;  %v226_v9 = vld [vmem:[%s2150_s4] sm:$0x3]  ;;  %v145_v13 = vld [vmem:[#allocation6] sm:$0x3]  ;;  %v1536_v7 = vld [vmem:[#allocation12 + $0x44] ss:$8 sps:$4 sm:$0xff]  }
  0x94   :  { %764 = vmatpush1.bf16.msra.mxu0 %v1480_v49  ;;  %v258_v12 = vld [vmem:[#allocation4] sm:$0x3]  ;;  %v241_v14 = vrot.slane %v226_v9, %v2067_v8  ;;  %v150_v17 = vrot.slane %v145_v13, %v2067_v8  ;;  %v245_v18 = vrot.slane %v226_v9, %v2072_v10  ;;  %v154_v19 = vrot.slane %v145_v13, %v2072_v10  ;;  %v1534_v9 = vld [vmem:[#allocation12 + $0x40] ss:$8 sps:$4 sm:$0xff]   ;;  %v1542_v13 = vld [vmem:[#allocation12 + $0x64] ss:$8 sps:$4 sm:$0xff]  }
  0x95   :  { %765 = vmatprep.subr.bf16.mxu0 %v1485_v50  ;;  %v273_v16 = vrot.slane %v258_v12, %v2067_v8  ;;  %v277_v21 = vrot.slane %v258_v12, %v2072_v10  ;;  %v1531_v6 = vld [vmem:[#allocation12 + $0x30] ss:$8 sps:$4 sm:$0xff]  }
  0x96   :  { %513 = vmatpush1.bf16.msra.mxu1 %v1443_v23  ;;  %v1537_v12 = vld [vmem:[#allocation12 + $0x50] ss:$8 sps:$4 sm:$0xff]  }
  0x97   :  { %514 = vmatprep.subr.bf16.mxu1 %v1444_v24 }
  0x98   :  { %766 = vmatpush1.bf16.msra.mxu0 %v1483_v51 }
  0x99   :  { %767 = vmatprep.subr.bf16.mxu0 %v1488_v52 }
  0x9a   :  { %515 = vmatpush1.bf16.msra.mxu1 %v1446_v25 }
  0x9b   :  { %516 = vmatprep.subr.bf16.mxu1 %v1447_v26 }
  0x9c   :  { %768 = vmatpush1.bf16.msra.mxu0 %v1486_v53 }
  0x9d   :  { %769 = vmatprep.subr.bf16.mxu0 %v1491_v54 }
  0x9e   :  { %517 = vmatpush1.bf16.msra.mxu1 %v1449_v27 }
  0x9f   :  { %518 = vmatprep.subr.bf16.mxu1 %v1450_v28 }
  0xa0   :  { %770 = vmatpush1.bf16.msra.mxu0 %v1489_v55 }
  0xa1   :  { %771 = vmatprep.subr.bf16.mxu0 %v1494_v56 }
  0xa2   :  { %519 = vmatpush1.bf16.msra.mxu1 %v1452_v29 }
  0xa3   :  { %520 = vmatprep.subr.bf16.mxu1 %v1453_v30 }
  0xa4   :  { %772 = vmatpush1.bf16.msra.mxu0 %v1492_v57  ;;  %v1515_v57 = vld [vmem:[#allocation9 + $0xd4] ss:$8 sps:$4 sm:$0xff]  }
  0xa5   :  { %773 = vmatprep.subr.bf16.mxu0 %v1497_v58  ;;  %v1513_v58 = vld [vmem:[#allocation9 + $0xd0] ss:$8 sps:$4 sm:$0xff]  }
  0xa6   :  { %521 = vmatpush1.bf16.msra.mxu1 %v1455_v31 }
  0xa7   :  { %522 = vmatprep.subr.bf16.mxu1 %v1456_v32 }
  0xa8   :  { %774 = vmatpush1.bf16.msra.mxu0 %v1495_v59  ;;  %v1518_v59 = vld [vmem:[#allocation9 + $0xe4] ss:$8 sps:$4 sm:$0xff]  }
  0xa9   :  { %775 = vmatprep.subr.bf16.mxu0 %v1500_v60  ;;  %v1516_v60 = vld [vmem:[#allocation9 + $0xe0] ss:$8 sps:$4 sm:$0xff]  }
  0xaa   :  { %523 = vmatpush1.bf16.msra.mxu1 %v1458_v33 }
  0xab   :  { %524 = vmatprep.subr.bf16.mxu1 %v1459_v34 }
  0xac   :  { %776 = vmatpush1.bf16.msra.mxu0 %v1498_v61  ;;  %v1521_v61 = vld [vmem:[#allocation9 + $0xf4] ss:$8 sps:$4 sm:$0xff]  }
  0xad   :  { %777 = vmatprep.subr.bf16.mxu0 %v1503_v62  ;;  %v1519_v62 = vld [vmem:[#allocation9 + $0xf0] ss:$8 sps:$4 sm:$0xff]  }
  0xae   :  { %525 = vmatpush1.bf16.msra.mxu1 %v1461_v35 }
  0xaf   :  { %526 = vmatprep.subr.bf16.mxu1 %v1462_v36 }
  0xb0   :  { %778 = vmatpush1.bf16.msra.mxu0 %v1501_v63  ;;  %v1522_v63 = vld [vmem:[#allocation12] ss:$8 sps:$4 sm:$0xff]  }
  0xb1   :  { %779 = vmatprep.subr.bf16.mxu0 %v1506_v0  ;;  %v1524_v0 = vld [vmem:[#allocation12 + $0x4] ss:$8 sps:$4 sm:$0xff]  }
  0xb2   :  { %527 = vmatpush1.bf16.msra.mxu1 %v1464_v37 }
  0xb3   :  { %528 = vmatprep.subr.bf16.mxu1 %v1465_v38 }
  0xb4   :  { %780 = vmatpush1.bf16.msra.mxu0 %v1504_v1  ;;  %v1527_v1 = vld [vmem:[#allocation12 + $0x14] ss:$8 sps:$4 sm:$0xff]  }
  0xb5   :  { %781 = vmatprep.subr.bf16.mxu0 %v1509_v2  ;;  %v1525_v2 = vld [vmem:[#allocation12 + $0x10] ss:$8 sps:$4 sm:$0xff]  }
  0xb6   :  { %529 = vmatpush1.bf16.msra.mxu1 %v1467_v39 }
  0xb7   :  { %530 = vmatprep.subr.bf16.mxu1 %v1468_v40 }
  0xb8   :  { %782 = vmatpush1.bf16.msra.mxu0 %v1507_v3  ;;  %v1530_v3 = vld [vmem:[#allocation12 + $0x24] ss:$8 sps:$4 sm:$0xff]  }
  0xb9   :  { %783 = vmatprep.subr.bf16.mxu0 %v1512_v4  ;;  %v1528_v4 = vld [vmem:[#allocation12 + $0x20] ss:$8 sps:$4 sm:$0xff]  }
  0xba   :  { %531 = vmatpush1.bf16.msra.mxu1 %v1470_v41 }
  0xbb   :  { %532 = vmatprep.subr.bf16.mxu1 %v1471_v42 }
  0xbc   :  { %784 = vmatpush1.bf16.msra.mxu0 %v1510_v5  ;;  %v1533_v5 = vld [vmem:[#allocation12 + $0x34] ss:$8 sps:$4 sm:$0xff]  }
  0xbd   :  { %785 = vmatprep.subr.bf16.mxu0 %v1515_v57  ;;  %v1573_v57 = vld [vmem:[%s2159_s13 + $0x8] sm:$0xff]  }
  0xbe   :  { %533 = vmatpush1.bf16.msra.mxu1 %v1473_v43 }
  0xbf   :  { %1016 = vmatprep.subr.bf16.mxu1 %v1524_v0  ;;  %v587_v0 = vld [vmem:[#allocation10] sm:$0x3] }
  0xc0   :  { %786 = vmatpush1.bf16.msra.mxu0 %v1513_v58  ;;  %v1574_v58 = vld [vmem:[%s2159_s13 + $0x50] sm:$0xff]  }
  0xc1   :  { %787 = vmatprep.subr.bf16.mxu0 %v1518_v59  ;;  %v1575_v59 = vld [vmem:[%s2159_s13 + $0x10] sm:$0xff]  }
  0xc4   :  { %788 = vmatpush1.bf16.msra.mxu0 %v1516_v60  ;;  %v1576_v60 = vld [vmem:[%s2159_s13 + $0x58] sm:$0xff]  }
  0xc5   :  { %789 = vmatprep.subr.bf16.mxu0 %v1521_v61  ;;  %v1577_v61 = vld [vmem:[%s2159_s13 + $0x18] sm:$0xff]  }
  0xc8   :  { %790 = vmatpush1.bf16.msra.mxu0 %v1519_v62  ;;  %v1578_v62 = vld [vmem:[%s2159_s13 + $0x60] sm:$0xff]  }
  0xfe   :  { %v230_v11 = vpop.permute.xlu0 %229 }
  0xff   :  { %v262_v15 = vpop.permute.xlu1 %261  ;;  %v248_v20 = vmul.f32 %v241_v14, %v230_v11  ;;  %v249_v27 = vmul.f32 %v245_v18, %v230_v11  ;;  %v1539_v11 = vld [vmem:[#allocation12 + $0x54] ss:$8 sps:$4 sm:$0xff]  }
 0x100   :  { %v280_v24 = vmul.f32 %v273_v16, %v262_v15  ;;  %v281_v35 = vmul.f32 %v277_v21, %v262_v15  ;;  %v1545_v15 = vld [vmem:[#allocation12 + $0x74] ss:$8 sps:$4 sm:$0xff]  }
 0x102   :  { %v235_v22 = vpop.permute.xlu0 %234 }
 0x103   :  { %v267_v28 = vpop.permute.xlu1 %266  ;;  %v250_v31 = vmul.f32 %v241_v14, %v235_v22  ;;  %v251_v36 = vmul.f32 %v245_v18, %v235_v22  ;;  %v1540_v14 = vld [vmem:[#allocation12 + $0x60] ss:$8 sps:$4 sm:$0xff]  }
 0x104   :  { %v282_v40 = vmul.f32 %v273_v16, %v267_v28  ;;  %v283_v42 = vmul.f32 %v277_v21, %v267_v28  ;;  %v1543_v16 = vld [vmem:[#allocation12 + $0x70] ss:$8 sps:$4 sm:$0xff]   ;;  %v1546_v18 = vld [vmem:[#allocation12 + $0x80] ss:$8 sps:$4 sm:$0xff]   ;;  %v1554_v21 = vld [vmem:[#allocation12 + $0xa4] ss:$8 sps:$4 sm:$0xff]  }
 0x105   :  { %v1552_v22 = vld [vmem:[#allocation12 + $0xa0] ss:$8 sps:$4 sm:$0xff]  }
 0x158   :  { %v215_v23 = vpop.f32.mrb[0].mxu0 }
 0x159   :  { %v216_v25 = vadd.f32 %v215_v23, %v150_v17  ;;  %v217_v26 = vpop.f32.mrb[1].mxu0  ;;  %v1557_v23 = vld [vmem:[#allocation12 + $0xb4] ss:$8 sps:$4 sm:$0xff]  }
 0x15a   :  { %v218_v29 = vadd.f32 %v217_v26, %v154_v19  ;;  %v219_v30 = vpop.f32.mrb[2].mxu0  ;;  %v1558_v26 = vld [vmem:[#allocation12 + $0xc0] ss:$8 sps:$4 sm:$0xff]  }
 0x15b   :  { %v252_v32 = vadd.f32 %v248_v20, %v216_v25  ;;  %v220_v33 = vadd.f32 %v219_v30, %v150_v17  ;;  %v221_v34 = vpop.f32.mrb[3].mxu0  ;;  %v1548_v17 = vld [vmem:[#allocation12 + $0x84] ss:$8 sps:$4 sm:$0xff]   ;;  %v1549_v20 = vld [vmem:[#allocation12 + $0x90] ss:$8 sps:$4 sm:$0xff]  }
 0x15c   :  { %v253_v37 = vadd.f32 %v249_v27, %v218_v29  ;;  %v222_v38 = vadd.f32 %v221_v34, %v154_v19  ;;  %v1551_v19 = vld [vmem:[#allocation12 + $0x94] ss:$8 sps:$4 sm:$0xff]   ;;  %v1560_v25 = vld [vmem:[#allocation12 + $0xc4] ss:$8 sps:$4 sm:$0xff]  }
 0x15d   :  { %v284_v39 = vadd.f32 %v280_v24, %v252_v32  ;;  %v254_v41 = vadd.f32 %v250_v31, %v220_v33  ;;  %v1555_v24 = vld [vmem:[#allocation12 + $0xb0] ss:$8 sps:$4 sm:$0xff]   ;;  %v330_v27 = vld [vmem:[#allocation7] sm:$0x3] }
 0x15e   :  { %v255_v43 = vadd.f32 %v251_v36, %v222_v38  ;;  %v285_v44 = vadd.f32 %v281_v35, %v253_v37  ;;  %v335_v28 = vrot.slane %v330_v27, %v2067_v8  ;;  %v339_v29 = vrot.slane %v330_v27, %v2072_v10  ;;  %v1584_v27 = vld [vmem:[%s2159_s13 + $0x78] sm:$0xff]  }
 0x15f   :  { %v288_v45 = vmul.f32 0.2, %v284_v39  ;;  %v286_v46 = vadd.f32 %v282_v40, %v254_v41 }
 0x160   :  { %v287_v47 = vadd.f32 %v283_v42, %v255_v43  ;;  %v289_v48 = vmul.f32 0.2, %v285_v44 }
 0x161   :  { %v290_v49 = vmul.f32 0.2, %v286_v46  ;;  %v292_v51 = vmax.f32 %v284_v39, %v288_v45 }
 0x162   :  { %v291_v50 = vmul.f32 0.2, %v287_v47  ;;  %v293_v53 = vmax.f32 %v285_v44, %v289_v48  ;;  %v1563_v48 = vld [vmem:[#allocation12 + $0xd4] ss:$8 sps:$4 sm:$0xff]  }
 0x163   :  { %v294_v52 = vmax.f32 %v286_v46, %v290_v49  ;;  %v1561_v49 = vld [vmem:[#allocation12 + $0xd0] ss:$8 sps:$4 sm:$0xff]  }
 0x164   :  { %v295_v54 = vmax.f32 %v287_v47, %v291_v50  ;;  %v1566_v50 = vld [vmem:[#allocation12 + $0xe4] ss:$8 sps:$4 sm:$0xff]  }
 0x165   :  { %v296_v55 = vpack.c.bf16 %v294_v52, %v292_v51  ;;  %v1564_v51 = vld [vmem:[#allocation12 + $0xe0] ss:$8 sps:$4 sm:$0xff]   ;;  %v1569_v52 = vld [vmem:[#allocation12 + $0xf4] ss:$8 sps:$4 sm:$0xff]  }
 0x166   :  { %v297_v56 = vpack.c.bf16 %v295_v54, %v293_v53  ;;  %v1567_v53 = vld [vmem:[#allocation12 + $0xf0] ss:$8 sps:$4 sm:$0xff]  }
 0x167   :  { %v1570_v54 = vld [vmem:[%s2159_s13 + $0x40] sm:$0xff]  }
 0x168   :  { %534 = vmatprep.mubr.bf16.mxu1 %v297_v56  ;;  %v1572_v56 = vld [vmem:[%s2159_s13 + $0x48] sm:$0xff]   ;;  %1386 = vmatprep.subr.bf16.mxu0 %v1570_v54 }
 0x169   :  { %535 = vmatmul.mubr.bf16.vlgmr.msra.gmra.mrb[0].mxu1 %v296_v55  ;;  %v1571_v55 = vld [vmem:[%s2159_s13] sm:$0xff]  }
 0x16a   :  { %1017 = vmatpush1.bf16.msra.mxu1 %v1522_v63  ;;  %v1579_v63 = vld [vmem:[%s2159_s13 + $0x20] sm:$0xff]  }
 0x16b   :  { %1018 = vmatprep.subr.bf16.mxu1 %v1527_v1  ;;  %v592_v1 = vrot.slane %v587_v0, %v2067_v8 }
 0x16e   :  { %1019 = vmatpush1.bf16.msra.mxu1 %v1525_v2  ;;  %v596_v2 = vrot.slane %v587_v0, %v2072_v10 }
 0x16f   :  { %1020 = vmatprep.subr.bf16.mxu1 %v1530_v3 }
 0x172   :  { %1021 = vmatpush1.bf16.msra.mxu1 %v1528_v4 }
 0x173   :  { %1022 = vmatprep.subr.bf16.mxu1 %v1533_v5 }
 0x176   :  { %1023 = vmatpush1.bf16.msra.mxu1 %v1531_v6 }
 0x177   :  { %1024 = vmatprep.subr.bf16.mxu1 %v1536_v7 }
 0x17a   :  { %1025 = vmatpush1.bf16.msra.mxu1 %v1534_v9 }
 0x17b   :  { %1026 = vmatprep.subr.bf16.mxu1 %v1539_v11 }
 0x17e   :  { %1027 = vmatpush1.bf16.msra.mxu1 %v1537_v12 }
 0x17f   :  { %1028 = vmatprep.subr.bf16.mxu1 %v1542_v13 }
 0x182   :  { %1029 = vmatpush1.bf16.msra.mxu1 %v1540_v14 }
 0x183   :  { %1030 = vmatprep.subr.bf16.mxu1 %v1545_v15 }
 0x186   :  { %1031 = vmatpush1.bf16.msra.mxu1 %v1543_v16 }
 0x187   :  { %1032 = vmatprep.subr.bf16.mxu1 %v1548_v17 }
 0x18a   :  { %1033 = vmatpush1.bf16.msra.mxu1 %v1546_v18 }
 0x18b   :  { %1034 = vmatprep.subr.bf16.mxu1 %v1551_v19 }
 0x18e   :  { %1035 = vmatpush1.bf16.msra.mxu1 %v1549_v20 }
 0x18f   :  { %1036 = vmatprep.subr.bf16.mxu1 %v1554_v21 }
 0x192   :  { %1037 = vmatpush1.bf16.msra.mxu1 %v1552_v22 }
 0x193   :  { %1038 = vmatprep.subr.bf16.mxu1 %v1557_v23  ;;  %v1580_v23 = vld [vmem:[%s2159_s13 + $0x68] sm:$0xff]  }
 0x196   :  { %1039 = vmatpush1.bf16.msra.mxu1 %v1555_v24  ;;  %v1581_v24 = vld [vmem:[%s2159_s13 + $0x28] sm:$0xff]  }
 0x197   :  { %1040 = vmatprep.subr.bf16.mxu1 %v1560_v25  ;;  %v1582_v25 = vld [vmem:[%s2159_s13 + $0x70] sm:$0xff]  }
 0x19a   :  { %1041 = vmatpush1.bf16.msra.mxu1 %v1558_v26  ;;  %v1583_v26 = vld [vmem:[%s2159_s13 + $0x30] sm:$0xff]  }
 0x19b   :  { %1042 = vmatprep.subr.bf16.mxu1 %v1563_v48 }
 0x19e   :  { %1043 = vmatpush1.bf16.msra.mxu1 %v1561_v49  ;;  %v1369_v49 = vld [vmem:[%s2160_s14] ss:$0 sm:$0xff] }
 0x19f   :  { %1044 = vmatprep.subr.bf16.mxu1 %v1566_v50 }
 0x1a2   :  { %1045 = vmatpush1.bf16.msra.mxu1 %v1564_v51 }
 0x1a3   :  { %1046 = vmatprep.subr.bf16.mxu1 %v1569_v52 }
 0x1a6   :  { %1047 = vmatpush1.bf16.msra.mxu1 %v1567_v53 }
 0x23c   :  { %v536_v30 = vpop.f32.mrb[0].mxu1 }
 0x23d   :  { %v537_v31 = vadd.f32 %v536_v30, %v335_v28  ;;  %v538_v32 = vpop.f32.mrb[1].mxu1 }
 0x23e   :  { %v539_v33 = vadd.f32 %v538_v32, %v339_v29  ;;  %v540_v34 = vpop.f32.mrb[2].mxu1 }
 0x23f   :  { %v545_v35 = vmul.f32 0.2, %v537_v31  ;;  %v541_v36 = vadd.f32 %v540_v34, %v335_v28  ;;  %v542_v37 = vpop.f32.mrb[3].mxu1  ;;  %v1585_v28 = vld [vmem:[%s2159_s13 + $0x38] sm:$0xff]  }
 0x240   :  { %v546_v38 = vmul.f32 0.2, %v539_v33  ;;  %v543_v39 = vadd.f32 %v542_v37, %v339_v29  ;;  %v844_v29 = vld [vmem:[%s2158_s12] sm:$0x3] }
 0x241   :  { %v547_v40 = vmul.f32 0.2, %v541_v36  ;;  %v549_v42 = vmax.f32 %v537_v31, %v545_v35  ;;  %v849_v30 = vrot.slane %v844_v29, %v2067_v8  ;;  %v853_v31 = vrot.slane %v844_v29, %v2072_v10 }
 0x242   :  { %v548_v41 = vmul.f32 0.2, %v543_v39  ;;  %v550_v44 = vmax.f32 %v539_v33, %v546_v38 }
 0x243   :  { %v551_v43 = vmax.f32 %v541_v36, %v547_v40 }
 0x244   :  { %v552_v45 = vmax.f32 %v543_v39, %v548_v41 }
 0x245   :  { %v553_v46 = vpack.c.bf16 %v551_v43, %v549_v42 }
 0x246   :  { %v554_v47 = vpack.c.bf16 %v552_v45, %v550_v44 }
 0x248   :  { %791 = vmatprep.mubr.bf16.mxu0 %v554_v47 }
 0x249   :  { %792 = vmatmul.mubr.bf16.vlgmr.msra.gmra.mrb[4].mxu0 %v553_v46 }
 0x24a   :  { %1387 = vmatpush3.bf16.msra.mxu0 %v1571_v55 }
 0x24b   :  { %1388 = vmatprep.subr.bf16.mxu0 %v1572_v56 }
 0x24e   :  { %1389 = vmatpush3.bf16.msra.mxu0 %v1573_v57 }
 0x24f   :  { %1390 = vmatprep.subr.bf16.mxu0 %v1574_v58 }
 0x252   :  { %1391 = vmatpush3.bf16.msra.mxu0 %v1575_v59 }
 0x253   :  { %1392 = vmatprep.subr.bf16.mxu0 %v1576_v60 }
 0x256   :  { %1393 = vmatpush3.bf16.msra.mxu0 %v1577_v61 }
 0x257   :  { %1394 = vmatprep.subr.bf16.mxu0 %v1578_v62 }
 0x25a   :  { %1395 = vmatpush3.bf16.msra.mxu0 %v1579_v63 }
 0x25b   :  { %1396 = vmatprep.subr.bf16.mxu0 %v1580_v23 }
 0x25e   :  { %1397 = vmatpush3.bf16.msra.mxu0 %v1581_v24 }
 0x25f   :  { %1398 = vmatprep.subr.bf16.mxu0 %v1582_v25 }
 0x262   :  { %1399 = vmatpush3.bf16.msra.mxu0 %v1583_v26 }
 0x263   :  { %1400 = vmatprep.subr.bf16.mxu0 %v1584_v27 }
 0x266   :  { %1401 = vmatpush3.bf16.msra.mxu0 %v1585_v28 }
 0x31c   :  { %v793_v3 = vpop.f32.mrb[4].mxu0 }
 0x31d   :  { %v794_v4 = vadd.f32 %v793_v3, %v592_v1  ;;  %v795_v5 = vpop.f32.mrb[5].mxu0 }
 0x31e   :  { %v796_v6 = vadd.f32 %v795_v5, %v596_v2  ;;  %v797_v7 = vpop.f32.mrb[6].mxu0 }
 0x31f   :  { %v802_v9 = vmul.f32 0.2, %v794_v4  ;;  %v798_v11 = vadd.f32 %v797_v7, %v592_v1  ;;  %v799_v12 = vpop.f32.mrb[7].mxu0 }
 0x320   :  { %v803_v13 = vmul.f32 0.2, %v796_v6  ;;  %v800_v14 = vadd.f32 %v799_v12, %v596_v2 }
 0x321   :  { %v804_v15 = vmul.f32 0.2, %v798_v11  ;;  %v806_v17 = vmax.f32 %v794_v4, %v802_v9 }
 0x322   :  { %v805_v16 = vmul.f32 0.2, %v800_v14  ;;  %v807_v19 = vmax.f32 %v796_v6, %v803_v13 }
 0x323   :  { %v808_v18 = vmax.f32 %v798_v11, %v804_v15 }
 0x324   :  { %v809_v20 = vmax.f32 %v800_v14, %v805_v16 }
 0x325   :  { %v810_v21 = vpack.c.bf16 %v808_v18, %v806_v17 }
 0x326   :  { %v811_v22 = vpack.c.bf16 %v809_v20, %v807_v19 }
 0x328   :  { %1048 = vmatprep.mubr.bf16.mxu1 %v811_v22 }
 0x329   :  { %1049 = vmatmul.mubr.bf16.vlgmr.msra.gmra.mrb[4].mxu1 %v810_v21 }
 0x3fc   :  { %v1050_v32 = vpop.f32.mrb[4].mxu1 }
 0x3fd   :  { %v1051_v33 = vadd.f32 %v1050_v32, %v849_v30  ;;  %v1052_v34 = vpop.f32.mrb[5].mxu1 }
 0x3fe   :  { %v1053_v35 = vadd.f32 %v1052_v34, %v853_v31  ;;  %v1054_v36 = vpop.f32.mrb[6].mxu1 }
 0x3ff   :  { %v1059_v37 = vmul.f32 0.2, %v1051_v33  ;;  %v1055_v38 = vadd.f32 %v1054_v36, %v849_v30  ;;  %v1056_v39 = vpop.f32.mrb[7].mxu1 }
 0x400   :  { %v1060_v40 = vmul.f32 0.2, %v1053_v35  ;;  %v1057_v41 = vadd.f32 %v1056_v39, %v853_v31 }
 0x401   :  { %v1061_v42 = vmul.f32 0.2, %v1055_v38  ;;  %v1063_v44 = vmax.f32 %v1051_v33, %v1059_v37 }
 0x402   :  { %v1062_v43 = vmul.f32 0.2, %v1057_v41  ;;  %v1064_v46 = vmax.f32 %v1053_v35, %v1060_v40 }
 0x403   :  { %v1065_v45 = vmax.f32 %v1055_v38, %v1061_v42 }
 0x404   :  { %v1066_v47 = vmax.f32 %v1057_v41, %v1062_v43 }
 0x405   :  { %v1067_v48 = vpack.c.bf16 %v1065_v45, %v1063_v44 }
 0x406   :  { %v1068_v8 = vpack.c.bf16 %v1066_v47, %v1064_v46 }
 0x408   :  { %1236 = vmatprep.mubr.bf16.mxu0 %v1068_v8 }
 0x409   :  { %1237 = vmatmul.mubr.bf16.vlgmr.msra.gmra.mrb[8].mxu0 %v1067_v48 }
 0x4dc   :  { %v1402_v10 = vpop.f32.mrb[8].mxu0 }
 0x4dd   :  { %v1403_v50 = vpop.f32.mrb[9].mxu0 }
 0x4de   :  { %v1404_v51 = vadd.f32 %v1403_v50, %v1402_v10  ;;  %v1405_v52 = vpop.f32.mrb[10].mxu0 }
 0x4df   :  { %v1406_v53 = vpop.f32.mrb[11].mxu0 }
 0x4e0   :  { %v1239_v54 = vadd.f32 %v1404_v51, %v1369_v49  ;;  %v1407_v55 = vadd.f32 %v1406_v53, %v1405_v52 }
 0x4e2   :  { %v1245_v56 = vsub.f32 0.0, %v1239_v54  ;;  %v1242_v57 = vadd.f32 %v1407_v55, %v1369_v49 }
 0x4e4   :  { %v1247_v58 = vmul.f32 1.442695, %v1245_v56  ;;  %v1246_v59 = vsub.f32 0.0, %v1242_v57 }
 0x4e6   :  { %1586 = vpow2.f32 %v1247_v58  ;;  %v1249_v60 = vmul.f32 1.442695, %v1246_v59 }
 0x4e8   :  { %1588 = vpow2.f32 %v1249_v60 }
 0x4f0   :  { %v1587_v61 = vpop.eup %1586 }
 0x4f1   :  { %v1251_v62 = vadd.f32 1.0, %v1587_v61 }
 0x4f2   :  { %v1589_v63 = vpop.eup %1588 }
 0x4f3   :  { %1590 = vrcp.f32 %v1251_v62  ;;  %v1252_v0 = vadd.f32 1.0, %v1589_v63 }
 0x4f5   :  { %1592 = vrcp.f32 %v1252_v0 }
 0x4fd   :  { %v1591_v1 = vpop.eup %1590 }
 0x4fe   :  { %1258 = vst.msk [vmem:[%s2161_s15] sm:$0xff] %vm1257_vm1, %v1591_v1 }
 0x4ff   :  { %v1593_v2 = vpop.eup %1592 }
 0x500   :  { %1259 = vst.msk [vmem:[%s2161_s15 + $0x8] sm:$0xff] %vm1257_vm1, %v1593_v2 }
 0x501   :  { %1264 = vsyncpa [#allocation3], 1 }
 0x502   :  { %1265 = vsyncpa [#allocation5], 1 }
 0x503   :  { %1266 = vsyncpa [#allocation8], 1 }
 0x504   :  { %1267 = vsyncpa [#allocation11], 1 }

</bundles_post_ra>
